<compile_context>
chip_gen: v7x
topology: tpu7x:2x2x1
jax: 0.10.0
libtpu: 0.0.40
codegen_flags: <defaults>
</compile_context>

<pallas_src>
import functools
import math

import jax
import jax.numpy as jnp
from jax import lax
from jax.experimental import pallas as pl
from jax.experimental.pallas import tpu as pltpu


def _device_kind() -> str:
    try:
        return jax.devices()[0].device_kind.lower()
    except Exception:
        return ""


def _pool_dtype():
    """bf16 pooling on chips with a bf16 VPU (v6e / v7x); f32 otherwise."""
    kind = _device_kind()
    if ("v6" in kind) or ("v7" in kind) or ("trillium" in kind):
        return jnp.bfloat16
    return jnp.float32


def _sppf_kernel(x_ref, w1_ref, b1_ref, w2_ref, b2_ref, o_ref, *, H, W,
                 pool_dtype):
    """One batch element per grid step.

    x_ref : (1, C1, H*W)    input (f32), NCHW with spatial flattened
    w1_ref: (C_, C1)        cv1 weight, bf16          b1_ref: (C_, 1) f32
    w2_ref: (4, C2, C_)     cv2 weight split per pooled slab, bf16
    b2_ref: (C2, 1) f32
    o_ref : (1, C2, H*W)
    """
    HW = H * W

    x = x_ref[0]                                             # (C1, HW)
    w1 = w1_ref[...]                                         # (C_, C1) bf16

    # ---- cv1: 1x1 conv == (C_, C1) @ (C1, HW), bf16 inputs, f32 accumulate.
    y0 = jnp.dot(w1, x.astype(jnp.bfloat16),
                 preferred_element_type=jnp.float32) + b1_ref[...]   # (C_, HW) f32

    # ---- Boundary masks: built ONCE, shape (1, HW), broadcast along sublanes.
    pos = lax.broadcasted_iota(jnp.int32, (1, HW), 1)        # flat index p = h*W + w
    col = lax.rem(pos, W)                                    # w index
    w_lo = col >= 1                                          # left  neighbour valid
    w_hi = col < (W - 1)                                     # right neighbour valid
    h_lo = pos >= W                                          # up    neighbour valid
    h_hi = pos < (HW - W)                                    # down  neighbour valid

    neg_inf = jnp.array(-jnp.inf, dtype=pool_dtype)

    def max3(y, shift, valid_lo, valid_hi):
        # Window-3 max along the flattened axis at stride `shift`.  Wrapped
        # values from the circular roll are masked to -inf; the un-shifted
        # center is always included so no output is ever -inf.
        lo = jnp.where(valid_lo, pltpu.roll(y, shift=shift, axis=1), neg_inf)
        hi = jnp.where(valid_hi, pltpu.roll(y, shift=HW - shift, axis=1), neg_inf)
        return jnp.maximum(y, jnp.maximum(lo, hi))

    def maxpool5(y):
        # Separable 5x5 (k=5, s=1, p=2): (max3 o max3) along W, then along H.
        m = max3(max3(y, 1, w_lo, w_hi), 1, w_lo, w_hi)
        m = max3(max3(m, W, h_lo, h_hi), W, h_lo, h_hi)
        return m

    # ---- cv2 as four accumulated partial matmuls interleaved with pooling.
    def partial_cv2(i, y):
        return jnp.dot(w2_ref[i], y.astype(jnp.bfloat16),
                       preferred_element_type=jnp.float32)   # (C2, HW) f32

    yp = y0.astype(pool_dtype)            # one-time rounding on v6e/v7x; no-op on v5e
    acc = partial_cv2(0, yp)
    y1 = maxpool5(yp)
    acc += partial_cv2(1, y1)
    y2 = maxpool5(y1)
    acc += partial_cv2(2, y2)
    y3 = maxpool5(y2)
    acc += partial_cv2(3, y3)

    out = acc + b2_ref[...]                                  # bias added once

    # Lane-dense store: minor dim = H*W >= 128.
    o_ref[0] = out.astype(o_ref.dtype)


def _vmem_limit_bytes(C1, C_, C2, HW, pool_bytes, kind):
    in_tile = C1 * HW * 4
    out_tile = C2 * HW * 4
    weights = (C_ * C1 + 4 * C_ * C2) * 2 + (C_ + C2) * 4
    inter = 2 * C_ * HW * pool_bytes + C2 * HW * 4           # live y's + acc
    need = 2 * (in_tile + out_tile) + 2 * weights + 4 * inter
    cap = (48 << 20) if "v7" in kind else (96 << 20)
    return int(min(cap, max(32 << 20, 2 * need)))


def sppf_forward(x_nchw, w1, b1, w2, b2):
    """SPPF forward.

    x_nchw: (N, C1, H, W) f32
    w1: (C_, C1)   b1: (C_, 1)   -- cv1 (1x1 conv) weight/bias, c_ = c1 // 2
    w2: (C2, 4*C_) b2: (C2, 1)   -- cv2 (1x1 conv) weight/bias
    returns (N, C2, H, W), same dtype as x
    """
    N, C1, H, W = x_nchw.shape
    C_ = w1.shape[0]
    C2 = w2.shape[0]
    HW = H * W

    x_flat = x_nchw.reshape(N, C1, HW)                 # free reshape (row-major)

    # One-time parameter prep: bf16 weights (kernel already rounds to bf16),
    # cv2 weight split per pooled slab -> (4, C2, C_).
    w1_bf = w1.astype(jnp.bfloat16)
    w2_bf = w2.reshape(C2, 4, C_).transpose(1, 0, 2).astype(jnp.bfloat16)

    kind = _device_kind()
    pool_dtype = _pool_dtype()
    pool_bytes = 2 if pool_dtype == jnp.bfloat16 else 4

    kernel = functools.partial(_sppf_kernel, H=H, W=W, pool_dtype=pool_dtype)

    out_flat = pl.pallas_call(
        kernel,
        # Output stays in the input dtype to preserve module semantics; emit
        # bf16 here instead if the downstream consumer accepts it (halves the
        # writeback DMA / vst pressure).
        out_shape=jax.ShapeDtypeStruct((N, C2, HW), x_nchw.dtype),
        grid_spec=pltpu.PrefetchScalarGridSpec(
            num_scalar_prefetch=0,
            grid=(N,),
            in_specs=[
                pl.BlockSpec((1, C1, HW), lambda n: (n, 0, 0)),
                pl.BlockSpec((C_, C1), lambda n: (0, 0)),
                pl.BlockSpec((C_, 1), lambda n: (0, 0)),
                pl.BlockSpec((4, C2, C_), lambda n: (0, 0, 0)),
                pl.BlockSpec((C2, 1), lambda n: (0, 0)),
            ],
            out_specs=pl.BlockSpec((1, C2, HW), lambda n: (n, 0, 0)),
        ),
        compiler_params=pltpu.CompilerParams(
            dimension_semantics=("parallel",),
            vmem_limit_bytes=_vmem_limit_bytes(C1, C_, C2, HW, pool_bytes, kind),
        ),
    )(x_flat, w1_bf, b1, w2_bf, b2)

    return out_flat.reshape(N, C2, H, W)               # free reshape


def _ref_sppf(x, w1, b1, w2, b2, *, bf16_inputs):
    """Pure-JAX reference.  If bf16_inputs, mirror the kernel's bf16 matmul-input
    rounding (f32 accumulate) so the comparison can be tight.  (Pooling the
    bf16-rounded y0 is identical to rounding the f32-pooled values because
    rounding is monotone and max selects one of its inputs.)"""
    def cast(a):
        return a.astype(jnp.bfloat16).astype(jnp.float32) if bf16_inputs else a

    y0 = jnp.einsum("oc,nchw->nohw", cast(w1), cast(x),
                    preferred_element_type=jnp.float32,
                    precision="highest") + b1[None, :, :, None]

    def mp(y):
        return lax.reduce_window(y, -jnp.inf, lax.max,
                                 (1, 1, 5, 5), (1, 1, 1, 1),
                                 [(0, 0), (0, 0), (2, 2), (2, 2)])

    y1 = mp(y0)
    y2 = mp(y1)
    y3 = mp(y2)
    cat = jnp.concatenate([y0, y1, y2, y3], axis=1)
    out = jnp.einsum("oc,nchw->nohw", cast(w2), cast(cat),
                     preferred_element_type=jnp.float32,
                     precision="highest") + b2[None, :, :, None]
    return out


if __name__ == "__main__":
    # Module hyper-params (small): c1=4, c2=8, k=5  ->  c_ = c1//2 = 2
    N, C1, H, W = 2, 4, 16, 16
    C2 = 8
    C_ = C1 // 2

    key = jax.random.PRNGKey(0)
    kx, kw1, kb1, kw2, kb2 = jax.random.split(key, 5)

    x = jax.random.normal(kx, (N, C1, H, W), dtype=jnp.float32)

    # Conv2d-style (kaiming-uniform) init for the 1x1 convs, stored directly in
    # the (out_channels, in_channels) matmul layout the kernel consumes.
    bnd1 = 1.0 / math.sqrt(C1)
    w1 = jax.random.uniform(kw1, (C_, C1), jnp.float32, -bnd1, bnd1)
    b1 = jax.random.uniform(kb1, (C_, 1), jnp.float32, -bnd1, bnd1)

    bnd2 = 1.0 / math.sqrt(4 * C_)
    w2 = jax.random.uniform(kw2, (C2, 4 * C_), jnp.float32, -bnd2, bnd2)
    b2 = jax.random.uniform(kb2, (C2, 1), jnp.float32, -bnd2, bnd2)

    out = jax.block_until_ready(sppf_forward(x, w1, b1, w2, b2))
    assert out.shape == (N, C2, H, W), out.shape

    # Tight check against a reference that mirrors the kernel's bf16 matmul
    # inputs (validates pooling / masking / partial-matmul accumulation).
    ref_bf16 = _ref_sppf(x, w1, b1, w2, b2, bf16_inputs=True)
    err1 = float(jnp.max(jnp.abs(out - ref_bf16)))
    assert jnp.allclose(out, ref_bf16, atol=1e-2, rtol=1e-3), err1

    # Looser check against the exact f32 semantics of the PyTorch module
    # (budget = bf16 rounding of the matmul inputs / pooled activations).
    ref_f32 = _ref_sppf(x, w1, b1, w2, b2, bf16_inputs=False)
    err2 = float(jnp.max(jnp.abs(out - ref_f32)))
    assert jnp.allclose(out, ref_f32, atol=1e-1, rtol=1e-1), err2

    print("KERNEL_OK")
</pallas_src>

<mosaic_0001>
module attributes {stable_mosaic.version = 11 : i64} {
  func.func @_sppf_kernel(%arg0: i32, %arg1: memref<1x4x256xf32, #tpu.memory_space<vmem>>, %arg2: memref<2x4xbf16, #tpu.memory_space<vmem>>, %arg3: memref<2x1xf32, #tpu.memory_space<vmem>>, %arg4: memref<4x8x2xbf16, #tpu.memory_space<vmem>>, %arg5: memref<8x1xf32, #tpu.memory_space<vmem>>, %arg6: memref<1x8x256xf32, #tpu.memory_space<vmem>>) attributes {dimension_semantics = [#tpu.dimension_semantics<parallel>], iteration_bounds = array<i64: 2>, scalar_prefetch = 0 : i64, scratch_operands = 0 : i64, tpu.core_type = #tpu.core_type<tc>, window_params = [{transform_indices = @transform_0, window_bounds = array<i64: 1, 4, 256>}, {pipeline_mode = #tpu.pipeline_mode<synchronous>, transform_indices = @transform_1, window_bounds = array<i64: 2, 4>}, {pipeline_mode = #tpu.pipeline_mode<synchronous>, transform_indices = @transform_2, window_bounds = array<i64: 2, 1>}, {pipeline_mode = #tpu.pipeline_mode<synchronous>, transform_indices = @transform_3, window_bounds = array<i64: 4, 8, 2>}, {pipeline_mode = #tpu.pipeline_mode<synchronous>, transform_indices = @transform_4, window_bounds = array<i64: 8, 1>}, {transform_indices = @transform_5, window_bounds = array<i64: 1, 8, 256>}]} {
    %c0 = arith.constant 0 : index
    %c0_0 = arith.constant 0 : index
    %c0_1 = arith.constant 0 : index
    %0 = vector.load %arg1[%c0, %c0_0, %c0_1] : memref<1x4x256xf32, #tpu.memory_space<vmem>>, vector<1x4x256xf32>
    %1 = vector.shape_cast %0 : vector<1x4x256xf32> to vector<4x256xf32>
    %c0_2 = arith.constant 0 : index
    %c0_3 = arith.constant 0 : index
    %2 = vector.load %arg2[%c0_2, %c0_3] : memref<2x4xbf16, #tpu.memory_space<vmem>>, vector<2x4xbf16>
    %3 = arith.truncf %1 : vector<4x256xf32> to vector<4x256xbf16>
    %cst = arith.constant dense<0.000000e+00> : vector<2x256xf32>
    %4 = tpu.matmul %2, %3, %cst {dimension_numbers = #tpu.dot_dimension_numbers<[1], [0], [0], [1], [0, 0, 1, 1], [], []>} : vector<2x4xbf16>, vector<4x256xbf16>, vector<2x256xf32> -> vector<2x256xf32>
    %c0_4 = arith.constant 0 : index
    %c0_5 = arith.constant 0 : index
    %5 = vector.load %arg3[%c0_4, %c0_5] : memref<2x1xf32, #tpu.memory_space<vmem>>, vector<2x1xf32>
    %6 = vector.broadcast %5 : vector<2x1xf32> to vector<2x256xf32>
    %7 = arith.addf %4, %6 : vector<2x256xf32>
    %8 = tpu.iota {dimensions = array<i32: 1>} : vector<1x256xi32>
    %c16_i32 = arith.constant 16 : i32
    %9 = vector.broadcast %c16_i32 : i32 to vector<1x256xi32>
    %10 = arith.remsi %8, %9 : vector<1x256xi32>
    %c1_i32 = arith.constant 1 : i32
    %11 = vector.broadcast %c1_i32 : i32 to vector<1x256xi32>
    %12 = arith.cmpi sge, %10, %11 : vector<1x256xi32>
    %c15_i32 = arith.constant 15 : i32
    %13 = vector.broadcast %c15_i32 : i32 to vector<1x256xi32>
    %14 = arith.cmpi slt, %10, %13 : vector<1x256xi32>
    %c16_i32_6 = arith.constant 16 : i32
    %15 = vector.broadcast %c16_i32_6 : i32 to vector<1x256xi32>
    %16 = arith.cmpi sge, %8, %15 : vector<1x256xi32>
    %c240_i32 = arith.constant 240 : i32
    %17 = vector.broadcast %c240_i32 : i32 to vector<1x256xi32>
    %18 = arith.cmpi slt, %8, %17 : vector<1x256xi32>
    %c0_7 = arith.constant 0 : index
    %c0_8 = arith.constant 0 : index
    %c0_9 = arith.constant 0 : index
    %19 = vector.load %arg4[%c0_7, %c0_8, %c0_9] : memref<4x8x2xbf16, #tpu.memory_space<vmem>>, vector<1x8x2xbf16>
    %20 = vector.shape_cast %19 : vector<1x8x2xbf16> to vector<8x2xbf16>
    %21 = arith.truncf %7 : vector<2x256xf32> to vector<2x256xbf16>
    %cst_10 = arith.constant dense<0.000000e+00> : vector<8x256xf32>
    %22 = tpu.matmul %20, %21, %cst_10 {dimension_numbers = #tpu.dot_dimension_numbers<[1], [0], [0], [1], [0, 0, 1, 1], [], []>} : vector<8x2xbf16>, vector<2x256xbf16>, vector<8x256xf32> -> vector<8x256xf32>
    %c1_i32_11 = arith.constant 1 : i32
    %23 = tpu.dynamic_rotate %7 by %c1_i32_11 dim 1 : vector<2x256xf32>, i32 -> vector<2x256xf32>
    %cst_12 = arith.constant 0xFF800000 : f32
    %24 = vector.shape_cast %12 : vector<1x256xi1> to vector<1x256xi1>
    %25 = vector.broadcast %24 : vector<1x256xi1> to vector<2x256xi1>
    %26 = vector.broadcast %cst_12 : f32 to vector<2x256xf32>
    %27 = arith.select %25, %23, %26 : vector<2x256xi1>, vector<2x256xf32>
    %c255_i32 = arith.constant 255 : i32
    %28 = tpu.dynamic_rotate %7 by %c255_i32 dim 1 : vector<2x256xf32>, i32 -> vector<2x256xf32>
    %cst_13 = arith.constant 0xFF800000 : f32
    %29 = vector.shape_cast %14 : vector<1x256xi1> to vector<1x256xi1>
    %30 = vector.broadcast %29 : vector<1x256xi1> to vector<2x256xi1>
    %31 = vector.broadcast %cst_13 : f32 to vector<2x256xf32>
    %32 = arith.select %30, %28, %31 : vector<2x256xi1>, vector<2x256xf32>
    %33 = arith.maximumf %27, %32 : vector<2x256xf32>
    %34 = arith.maximumf %7, %33 : vector<2x256xf32>
    %c1_i32_14 = arith.constant 1 : i32
    %35 = tpu.dynamic_rotate %34 by %c1_i32_14 dim 1 : vector<2x256xf32>, i32 -> vector<2x256xf32>
    %cst_15 = arith.constant 0xFF800000 : f32
    %36 = vector.shape_cast %12 : vector<1x256xi1> to vector<1x256xi1>
    %37 = vector.broadcast %36 : vector<1x256xi1> to vector<2x256xi1>
    %38 = vector.broadcast %cst_15 : f32 to vector<2x256xf32>
    %39 = arith.select %37, %35, %38 : vector<2x256xi1>, vector<2x256xf32>
    %c255_i32_16 = arith.constant 255 : i32
    %40 = tpu.dynamic_rotate %34 by %c255_i32_16 dim 1 : vector<2x256xf32>, i32 -> vector<2x256xf32>
    %cst_17 = arith.constant 0xFF800000 : f32
    %41 = vector.shape_cast %14 : vector<1x256xi1> to vector<1x256xi1>
    %42 = vector.broadcast %41 : vector<1x256xi1> to vector<2x256xi1>
    %43 = vector.broadcast %cst_17 : f32 to vector<2x256xf32>
    %44 = arith.select %42, %40, %43 : vector<2x256xi1>, vector<2x256xf32>
    %45 = arith.maximumf %39, %44 : vector<2x256xf32>
    %46 = arith.maximumf %34, %45 : vector<2x256xf32>
    %c16_i32_18 = arith.constant 16 : i32
    %47 = tpu.dynamic_rotate %46 by %c16_i32_18 dim 1 : vector<2x256xf32>, i32 -> vector<2x256xf32>
    %cst_19 = arith.constant 0xFF800000 : f32
    %48 = vector.shape_cast %16 : vector<1x256xi1> to vector<1x256xi1>
    %49 = vector.broadcast %48 : vector<1x256xi1> to vector<2x256xi1>
    %50 = vector.broadcast %cst_19 : f32 to vector<2x256xf32>
    %51 = arith.select %49, %47, %50 : vector<2x256xi1>, vector<2x256xf32>
    %c240_i32_20 = arith.constant 240 : i32
    %52 = tpu.dynamic_rotate %46 by %c240_i32_20 dim 1 : vector<2x256xf32>, i32 -> vector<2x256xf32>
    %cst_21 = arith.constant 0xFF800000 : f32
    %53 = vector.shape_cast %18 : vector<1x256xi1> to vector<1x256xi1>
    %54 = vector.broadcast %53 : vector<1x256xi1> to vector<2x256xi1>
    %55 = vector.broadcast %cst_21 : f32 to vector<2x256xf32>
    %56 = arith.select %54, %52, %55 : vector<2x256xi1>, vector<2x256xf32>
    %57 = arith.maximumf %51, %56 : vector<2x256xf32>
    %58 = arith.maximumf %46, %57 : vector<2x256xf32>
    %c16_i32_22 = arith.constant 16 : i32
    %59 = tpu.dynamic_rotate %58 by %c16_i32_22 dim 1 : vector<2x256xf32>, i32 -> vector<2x256xf32>
    %cst_23 = arith.constant 0xFF800000 : f32
    %60 = vector.shape_cast %16 : vector<1x256xi1> to vector<1x256xi1>
    %61 = vector.broadcast %60 : vector<1x256xi1> to vector<2x256xi1>
    %62 = vector.broadcast %cst_23 : f32 to vector<2x256xf32>
    %63 = arith.select %61, %59, %62 : vector<2x256xi1>, vector<2x256xf32>
    %c240_i32_24 = arith.constant 240 : i32
    %64 = tpu.dynamic_rotate %58 by %c240_i32_24 dim 1 : vector<2x256xf32>, i32 -> vector<2x256xf32>
    %cst_25 = arith.constant 0xFF800000 : f32
    %65 = vector.shape_cast %18 : vector<1x256xi1> to vector<1x256xi1>
    %66 = vector.broadcast %65 : vector<1x256xi1> to vector<2x256xi1>
    %67 = vector.broadcast %cst_25 : f32 to vector<2x256xf32>
    %68 = arith.select %66, %64, %67 : vector<2x256xi1>, vector<2x256xf32>
    %69 = arith.maximumf %63, %68 : vector<2x256xf32>
    %70 = arith.maximumf %58, %69 : vector<2x256xf32>
    %c1 = arith.constant 1 : index
    %c0_26 = arith.constant 0 : index
    %c0_27 = arith.constant 0 : index
    %71 = vector.load %arg4[%c1, %c0_26, %c0_27] : memref<4x8x2xbf16, #tpu.memory_space<vmem>>, vector<1x8x2xbf16>
    %72 = vector.shape_cast %71 : vector<1x8x2xbf16> to vector<8x2xbf16>
    %73 = arith.truncf %70 : vector<2x256xf32> to vector<2x256xbf16>
    %cst_28 = arith.constant dense<0.000000e+00> : vector<8x256xf32>
    %74 = tpu.matmul %72, %73, %cst_28 {dimension_numbers = #tpu.dot_dimension_numbers<[1], [0], [0], [1], [0, 0, 1, 1], [], []>} : vector<8x2xbf16>, vector<2x256xbf16>, vector<8x256xf32> -> vector<8x256xf32>
    %75 = arith.addf %22, %74 : vector<8x256xf32>
    %c1_i32_29 = arith.constant 1 : i32
    %76 = tpu.dynamic_rotate %70 by %c1_i32_29 dim 1 : vector<2x256xf32>, i32 -> vector<2x256xf32>
    %cst_30 = arith.constant 0xFF800000 : f32
    %77 = vector.shape_cast %12 : vector<1x256xi1> to vector<1x256xi1>
    %78 = vector.broadcast %77 : vector<1x256xi1> to vector<2x256xi1>
    %79 = vector.broadcast %cst_30 : f32 to vector<2x256xf32>
    %80 = arith.select %78, %76, %79 : vector<2x256xi1>, vector<2x256xf32>
    %c255_i32_31 = arith.constant 255 : i32
    %81 = tpu.dynamic_rotate %70 by %c255_i32_31 dim 1 : vector<2x256xf32>, i32 -> vector<2x256xf32>
    %cst_32 = arith.constant 0xFF800000 : f32
    %82 = vector.shape_cast %14 : vector<1x256xi1> to vector<1x256xi1>
    %83 = vector.broadcast %82 : vector<1x256xi1> to vector<2x256xi1>
    %84 = vector.broadcast %cst_32 : f32 to vector<2x256xf32>
    %85 = arith.select %83, %81, %84 : vector<2x256xi1>, vector<2x256xf32>
    %86 = arith.maximumf %80, %85 : vector<2x256xf32>
    %87 = arith.maximumf %70, %86 : vector<2x256xf32>
    %c1_i32_33 = arith.constant 1 : i32
    %88 = tpu.dynamic_rotate %87 by %c1_i32_33 dim 1 : vector<2x256xf32>, i32 -> vector<2x256xf32>
    %cst_34 = arith.constant 0xFF800000 : f32
    %89 = vector.shape_cast %12 : vector<1x256xi1> to vector<1x256xi1>
    %90 = vector.broadcast %89 : vector<1x256xi1> to vector<2x256xi1>
    %91 = vector.broadcast %cst_34 : f32 to vector<2x256xf32>
    %92 = arith.select %90, %88, %91 : vector<2x256xi1>, vector<2x256xf32>
    %c255_i32_35 = arith.constant 255 : i32
    %93 = tpu.dynamic_rotate %87 by %c255_i32_35 dim 1 : vector<2x256xf32>, i32 -> vector<2x256xf32>
    %cst_36 = arith.constant 0xFF800000 : f32
    %94 = vector.shape_cast %14 : vector<1x256xi1> to vector<1x256xi1>
    %95 = vector.broadcast %94 : vector<1x256xi1> to vector<2x256xi1>
    %96 = vector.broadcast %cst_36 : f32 to vector<2x256xf32>
    %97 = arith.select %95, %93, %96 : vector<2x256xi1>, vector<2x256xf32>
    %98 = arith.maximumf %92, %97 : vector<2x256xf32>
    %99 = arith.maximumf %87, %98 : vector<2x256xf32>
    %c16_i32_37 = arith.constant 16 : i32
    %100 = tpu.dynamic_rotate %99 by %c16_i32_37 dim 1 : vector<2x256xf32>, i32 -> vector<2x256xf32>
    %cst_38 = arith.constant 0xFF800000 : f32
    %101 = vector.shape_cast %16 : vector<1x256xi1> to vector<1x256xi1>
    %102 = vector.broadcast %101 : vector<1x256xi1> to vector<2x256xi1>
    %103 = vector.broadcast %cst_38 : f32 to vector<2x256xf32>
    %104 = arith.select %102, %100, %103 : vector<2x256xi1>, vector<2x256xf32>
    %c240_i32_39 = arith.constant 240 : i32
    %105 = tpu.dynamic_rotate %99 by %c240_i32_39 dim 1 : vector<2x256xf32>, i32 -> vector<2x256xf32>
    %cst_40 = arith.constant 0xFF800000 : f32
    %106 = vector.shape_cast %18 : vector<1x256xi1> to vector<1x256xi1>
    %107 = vector.broadcast %106 : vector<1x256xi1> to vector<2x256xi1>
    %108 = vector.broadcast %cst_40 : f32 to vector<2x256xf32>
    %109 = arith.select %107, %105, %108 : vector<2x256xi1>, vector<2x256xf32>
    %110 = arith.maximumf %104, %109 : vector<2x256xf32>
    %111 = arith.maximumf %99, %110 : vector<2x256xf32>
    %c16_i32_41 = arith.constant 16 : i32
    %112 = tpu.dynamic_rotate %111 by %c16_i32_41 dim 1 : vector<2x256xf32>, i32 -> vector<2x256xf32>
    %cst_42 = arith.constant 0xFF800000 : f32
    %113 = vector.shape_cast %16 : vector<1x256xi1> to vector<1x256xi1>
    %114 = vector.broadcast %113 : vector<1x256xi1> to vector<2x256xi1>
    %115 = vector.broadcast %cst_42 : f32 to vector<2x256xf32>
    %116 = arith.select %114, %112, %115 : vector<2x256xi1>, vector<2x256xf32>
    %c240_i32_43 = arith.constant 240 : i32
    %117 = tpu.dynamic_rotate %111 by %c240_i32_43 dim 1 : vector<2x256xf32>, i32 -> vector<2x256xf32>
    %cst_44 = arith.constant 0xFF800000 : f32
    %118 = vector.shape_cast %18 : vector<1x256xi1> to vector<1x256xi1>
    %119 = vector.broadcast %118 : vector<1x256xi1> to vector<2x256xi1>
    %120 = vector.broadcast %cst_44 : f32 to vector<2x256xf32>
    %121 = arith.select %119, %117, %120 : vector<2x256xi1>, vector<2x256xf32>
    %122 = arith.maximumf %116, %121 : vector<2x256xf32>
    %123 = arith.maximumf %111, %122 : vector<2x256xf32>
    %c2 = arith.constant 2 : index
    %c0_45 = arith.constant 0 : index
    %c0_46 = arith.constant 0 : index
    %124 = vector.load %arg4[%c2, %c0_45, %c0_46] : memref<4x8x2xbf16, #tpu.memory_space<vmem>>, vector<1x8x2xbf16>
    %125 = vector.shape_cast %124 : vector<1x8x2xbf16> to vector<8x2xbf16>
    %126 = arith.truncf %123 : vector<2x256xf32> to vector<2x256xbf16>
    %cst_47 = arith.constant dense<0.000000e+00> : vector<8x256xf32>
    %127 = tpu.matmul %125, %126, %cst_47 {dimension_numbers = #tpu.dot_dimension_numbers<[1], [0], [0], [1], [0, 0, 1, 1], [], []>} : vector<8x2xbf16>, vector<2x256xbf16>, vector<8x256xf32> -> vector<8x256xf32>
    %128 = arith.addf %75, %127 : vector<8x256xf32>
    %c1_i32_48 = arith.constant 1 : i32
    %129 = tpu.dynamic_rotate %123 by %c1_i32_48 dim 1 : vector<2x256xf32>, i32 -> vector<2x256xf32>
    %cst_49 = arith.constant 0xFF800000 : f32
    %130 = vector.shape_cast %12 : vector<1x256xi1> to vector<1x256xi1>
    %131 = vector.broadcast %130 : vector<1x256xi1> to vector<2x256xi1>
    %132 = vector.broadcast %cst_49 : f32 to vector<2x256xf32>
    %133 = arith.select %131, %129, %132 : vector<2x256xi1>, vector<2x256xf32>
    %c255_i32_50 = arith.constant 255 : i32
    %134 = tpu.dynamic_rotate %123 by %c255_i32_50 dim 1 : vector<2x256xf32>, i32 -> vector<2x256xf32>
    %cst_51 = arith.constant 0xFF800000 : f32
    %135 = vector.shape_cast %14 : vector<1x256xi1> to vector<1x256xi1>
    %136 = vector.broadcast %135 : vector<1x256xi1> to vector<2x256xi1>
    %137 = vector.broadcast %cst_51 : f32 to vector<2x256xf32>
    %138 = arith.select %136, %134, %137 : vector<2x256xi1>, vector<2x256xf32>
    %139 = arith.maximumf %133, %138 : vector<2x256xf32>
    %140 = arith.maximumf %123, %139 : vector<2x256xf32>
    %c1_i32_52 = arith.constant 1 : i32
    %141 = tpu.dynamic_rotate %140 by %c1_i32_52 dim 1 : vector<2x256xf32>, i32 -> vector<2x256xf32>
    %cst_53 = arith.constant 0xFF800000 : f32
    %142 = vector.shape_cast %12 : vector<1x256xi1> to vector<1x256xi1>
    %143 = vector.broadcast %142 : vector<1x256xi1> to vector<2x256xi1>
    %144 = vector.broadcast %cst_53 : f32 to vector<2x256xf32>
    %145 = arith.select %143, %141, %144 : vector<2x256xi1>, vector<2x256xf32>
    %c255_i32_54 = arith.constant 255 : i32
    %146 = tpu.dynamic_rotate %140 by %c255_i32_54 dim 1 : vector<2x256xf32>, i32 -> vector<2x256xf32>
    %cst_55 = arith.constant 0xFF800000 : f32
    %147 = vector.shape_cast %14 : vector<1x256xi1> to vector<1x256xi1>
    %148 = vector.broadcast %147 : vector<1x256xi1> to vector<2x256xi1>
    %149 = vector.broadcast %cst_55 : f32 to vector<2x256xf32>
    %150 = arith.select %148, %146, %149 : vector<2x256xi1>, vector<2x256xf32>
    %151 = arith.maximumf %145, %150 : vector<2x256xf32>
    %152 = arith.maximumf %140, %151 : vector<2x256xf32>
    %c16_i32_56 = arith.constant 16 : i32
    %153 = tpu.dynamic_rotate %152 by %c16_i32_56 dim 1 : vector<2x256xf32>, i32 -> vector<2x256xf32>
    %cst_57 = arith.constant 0xFF800000 : f32
    %154 = vector.shape_cast %16 : vector<1x256xi1> to vector<1x256xi1>
    %155 = vector.broadcast %154 : vector<1x256xi1> to vector<2x256xi1>
    %156 = vector.broadcast %cst_57 : f32 to vector<2x256xf32>
    %157 = arith.select %155, %153, %156 : vector<2x256xi1>, vector<2x256xf32>
    %c240_i32_58 = arith.constant 240 : i32
    %158 = tpu.dynamic_rotate %152 by %c240_i32_58 dim 1 : vector<2x256xf32>, i32 -> vector<2x256xf32>
    %cst_59 = arith.constant 0xFF800000 : f32
    %159 = vector.shape_cast %18 : vector<1x256xi1> to vector<1x256xi1>
    %160 = vector.broadcast %159 : vector<1x256xi1> to vector<2x256xi1>
    %161 = vector.broadcast %cst_59 : f32 to vector<2x256xf32>
    %162 = arith.select %160, %158, %161 : vector<2x256xi1>, vector<2x256xf32>
    %163 = arith.maximumf %157, %162 : vector<2x256xf32>
    %164 = arith.maximumf %152, %163 : vector<2x256xf32>
    %c16_i32_60 = arith.constant 16 : i32
    %165 = tpu.dynamic_rotate %164 by %c16_i32_60 dim 1 : vector<2x256xf32>, i32 -> vector<2x256xf32>
    %cst_61 = arith.constant 0xFF800000 : f32
    %166 = vector.shape_cast %16 : vector<1x256xi1> to vector<1x256xi1>
    %167 = vector.broadcast %166 : vector<1x256xi1> to vector<2x256xi1>
    %168 = vector.broadcast %cst_61 : f32 to vector<2x256xf32>
    %169 = arith.select %167, %165, %168 : vector<2x256xi1>, vector<2x256xf32>
    %c240_i32_62 = arith.constant 240 : i32
    %170 = tpu.dynamic_rotate %164 by %c240_i32_62 dim 1 : vector<2x256xf32>, i32 -> vector<2x256xf32>
    %cst_63 = arith.constant 0xFF800000 : f32
    %171 = vector.shape_cast %18 : vector<1x256xi1> to vector<1x256xi1>
    %172 = vector.broadcast %171 : vector<1x256xi1> to vector<2x256xi1>
    %173 = vector.broadcast %cst_63 : f32 to vector<2x256xf32>
    %174 = arith.select %172, %170, %173 : vector<2x256xi1>, vector<2x256xf32>
    %175 = arith.maximumf %169, %174 : vector<2x256xf32>
    %176 = arith.maximumf %164, %175 : vector<2x256xf32>
    %c3 = arith.constant 3 : index
    %c0_64 = arith.constant 0 : index
    %c0_65 = arith.constant 0 : index
    %177 = vector.load %arg4[%c3, %c0_64, %c0_65] : memref<4x8x2xbf16, #tpu.memory_space<vmem>>, vector<1x8x2xbf16>
    %178 = vector.shape_cast %177 : vector<1x8x2xbf16> to vector<8x2xbf16>
    %179 = arith.truncf %176 : vector<2x256xf32> to vector<2x256xbf16>
    %cst_66 = arith.constant dense<0.000000e+00> : vector<8x256xf32>
    %180 = tpu.matmul %178, %179, %cst_66 {dimension_numbers = #tpu.dot_dimension_numbers<[1], [0], [0], [1], [0, 0, 1, 1], [], []>} : vector<8x2xbf16>, vector<2x256xbf16>, vector<8x256xf32> -> vector<8x256xf32>
    %181 = arith.addf %128, %180 : vector<8x256xf32>
    %c0_67 = arith.constant 0 : index
    %c0_68 = arith.constant 0 : index
    %182 = vector.load %arg5[%c0_67, %c0_68] : memref<8x1xf32, #tpu.memory_space<vmem>>, vector<8x1xf32>
    %183 = vector.broadcast %182 : vector<8x1xf32> to vector<8x256xf32>
    %184 = arith.addf %181, %183 : vector<8x256xf32>
    %c0_69 = arith.constant 0 : index
    %c0_70 = arith.constant 0 : index
    %c0_71 = arith.constant 0 : index
    %185 = vector.load %arg6[%c0_69, %c0_70, %c0_71] : memref<1x8x256xf32, #tpu.memory_space<vmem>>, vector<1x8x256xf32>
    %186 = vector.shape_cast %185 : vector<1x8x256xf32> to vector<8x256xf32>
    %187 = vector.shape_cast %184 : vector<8x256xf32> to vector<1x8x256xf32>
    tpu.vector_store %arg6[%c0_69, %c0_70, %c0_71], %187 {strides = array<i32>} : memref<1x8x256xf32, #tpu.memory_space<vmem>>, vector<1x8x256xf32>,
    return
  }
  func.func @transform_0(%arg0: i32) -> (i32, i32, i32) {
    %c0_i32 = arith.constant 0 : i32
    %c0_i32_0 = arith.constant 0 : i32
    %c0_i32_1 = arith.constant 0 : i32
    return %arg0, %c0_i32, %c0_i32_0 : i32, i32, i32
  }
  func.func @transform_1(%arg0: i32) -> (i32, i32) {
    %c0_i32 = arith.constant 0 : i32
    %c0_i32_0 = arith.constant 0 : i32
    %c0_i32_1 = arith.constant 0 : i32
    return %c0_i32, %c0_i32_0 : i32, i32
  }
  func.func @transform_2(%arg0: i32) -> (i32, i32) {
    %c0_i32 = arith.constant 0 : i32
    %c0_i32_0 = arith.constant 0 : i32
    %c0_i32_1 = arith.constant 0 : i32
    return %c0_i32, %c0_i32_0 : i32, i32
  }
  func.func @transform_3(%arg0: i32) -> (i32, i32, i32) {
    %c0_i32 = arith.constant 0 : i32
    %c0_i32_0 = arith.constant 0 : i32
    %c0_i32_1 = arith.constant 0 : i32
    %c0_i32_2 = arith.constant 0 : i32
    return %c0_i32, %c0_i32_0, %c0_i32_1 : i32, i32, i32
  }
  func.func @transform_4(%arg0: i32) -> (i32, i32) {
    %c0_i32 = arith.constant 0 : i32
    %c0_i32_0 = arith.constant 0 : i32
    %c0_i32_1 = arith.constant 0 : i32
    return %c0_i32, %c0_i32_0 : i32, i32
  }
  func.func @transform_5(%arg0: i32) -> (i32, i32, i32) {
    %c0_i32 = arith.constant 0 : i32
    %c0_i32_0 = arith.constant 0 : i32
    %c0_i32_1 = arith.constant 0 : i32
    return %arg0, %c0_i32, %c0_i32_0 : i32, i32, i32
  }
}

</mosaic_0001>

<bundles_post_ra>
// kernel: tpu_custom_call.1
= control target key start
LH: loop header
LB: loop body
LE: loop exit
PB: predicated region body
PF: predicated region fallthrough
CT: control target
= control target key end

     0   :  { %10 = vsyncpa [#allocation3], 0  ;;  %s1534_s0 = inlined_call_operand.vmem [shape: f32[2,4,256], index: 0, kind: input, shape index: {}]   ;;  %s1535_s1 = inlined_call_operand.vmem [shape: bf16[2,4], index: 1, kind: input, shape index: {}]   ;;  %s1536_s2 = inlined_call_operand.vmem [shape: f32[2,1], index: 2, kind: input, shape index: {}]   ;;  %s1537_s3 = inlined_call_operand.vmem [shape: bf16[4,8,2], index: 3, kind: input, shape index: {}]   ;;  %s1538_s4 = inlined_call_operand.vmem [shape: f32[8,1], index: 4, kind: input, shape index: {}]   ;;  %s1539_s5 = inlined_call_operand.hbm [shape: f32[2,8,256], index: 5, kind: output, shape index: {}]  }
   0x1   :  { %12 = vsyncpa [#allocation3 + $0x1], 0  ;;  %s1173_s18 = smov 0   ;;  %s1175_s19 = smov 0  }
   0x2   :  { %s1177_s20 = smov 0   ;;  %s1179_s21 = smov 0  }
   0x3 LB: > { %s1194_s22 = sadd.s32 4294967295, %s1135_s21   ;;  %s879_s23 = sadd.s32 4294967294, %s1135_s21   ;;  %s1135_s21 = sphi %s1179_s21, %s1553_s21   ;;  %s1131_s20 = sphi %s1177_s20, %s1552_s20   ;;  %s1127_s19 = sphi %s1175_s19, %s1551_s19   ;;  %s1123_s18 = sphi %s1173_s18, %s1550_s18  }
   0x4   : > { %s1198_s24 = sadd.s32 1, %s1135_s21   ;;  %s135_s25 = sadd.s32 1, %s1131_s20 }
   0x5   : > { %s132_s26 = ssub.s32 %s1135_s21, %s1198_s24  ;;  %p145_p0 = scmp.ne.s32.totalorder %s1131_s20, %s1127_s19 }
   0x6   : > { %p133_p1 = scmp.eq.s32.totalorder %s132_s26, 0  ;;  %p146_p2 = scmp.eq.s32.totalorder %s1194_s22, 1 }
   0x7   : > { %p151_p3 = scmp.ne.s32.totalorder %s1127_s19, %s1123_s18  ;;  %p152_p4 = scmp.eq.s32.totalorder %s879_s23, 1 }
   0x8   : > { %s1209_s27 = scalar_select %p133_p1, %s1131_s20, %s135_s25  }
   0x9   : > { %p1211_p5 = por %p146_p2, %p145_p0  ;;  %p1215_p6 = por %p152_p4, %p151_p3 }
   0xa   : > { %p882_p7 = scmp.ge.s32.totalorder %s1135_s21, 1  ;;  %p190_p8 = scmp.lt.s32.totalorder %s1135_s21, 3 }
   0xc   : > { %p191_p9 = pnand %p882_p7, %p190_p8 }
   0xd   : > { %p218_p10 = scmp.lt.s32.totalorder (!%p191_p9), %s1194_s22, 1  ;;  %v1137_v0 = vmov (!%p191_p9), 0   ;;  %v231_v1 = vld [vmem:[%s1536_s2] sm:$0x3] (!%p191_p9)  ;;  %vm241_vm0 = vcmask (!%p191_p9), 1041408   ;;  %vm237_vm1 = vcmask (!%p191_p9), 31744   ;;  %v289_v19 = vlaneseq (!%p191_p9) }
   0xe   : > { %194 = sbr.rel (%p191_p9) target bundleno = 1987 (0x7c3), region = 40  ;;  %280 = vmatprep.mubr.bf16.mxu0 (!%p191_p9), %v1137_v0  ;;  %950 = vset.pattern.permute.xlu0 (!%p191_p9), %v1137_v0  ;;  %v225_v7 = vld [vmem:[%s1535_s1] sm:$0x1] (!%p191_p9)  ;;  %vm425_vm2 = vcmask (!%p191_p9), 1040384   ;;  %s1138_s14 = smov (!%p191_p9), 127   ;;  %vm421_vm13 = vcmask (!%p191_p9), 15360  }
   0xf   : > { %234 = vperm.xlu0 (!%p191_p9), %950, %v231_v1   ;;  %464 = vmatprep.mubr.bf16.mxu1 (!%p191_p9), %v1137_v0  ;;  %s1139_s15 = smov (!%p191_p9), 1   ;;  %v1241_v20 = vand.u32 (!%p191_p9), 127, %v289_v19  ;;  %s1140_s16 = smov (!%p191_p9), 112   ;;  %v314_v30 = vld [vmem:[%s1537_s3] sm:$0xf] (!%p191_p9) }
  0x10   : > { %1071 = vset.pattern.permute.xlu1 (!%p191_p9), %v1137_v0  ;;  %s1141_s17 = smov (!%p191_p9), 16   ;;  %v893_v31 = vld [vmem:[%s1537_s3 + $0x8] sm:$0xf] (!%p191_p9)  ;;  %s215_s12 = sand.u32 (!%p191_p9), 1, %s1127_s19  }
  0x11   : > { %v1244_v21 = vadd.s32 (!%p191_p9), 128, %v1241_v20  ;;  %v296_v22 = vand.u32 (!%p191_p9), 15, %v1241_v20  ;;  %vm334_vm4 = vcmp.lt.s32.totalorder (!%p191_p9), %v1241_v20, 127  ;;  %vm321_vm6 = vcmp.lt.s32.totalorder (!%p191_p9), %v1241_v20, 1  ;;  %s883_s13 = sshll.u32 (!%p191_p9), %s215_s12, 4  ;;  %s1142_s30 = smov (!%p191_p9), [#allocation2]  }
  0x12   : > { %vm384_vm10 = vcmp.lt.s32.totalorder (!%p191_p9), %v1241_v20, 112  ;;  %vm310_vm11 = vcmp.ge.s32.totalorder (!%p191_p9), %v1241_v20, 16  ;;  %vm371_vm12 = vcmp.lt.s32.totalorder (!%p191_p9), %v1241_v20, 16  ;;  %s1077_s6 = sshll.u32 (!%p191_p9), %s1142_s30, 4  ;;  %s1078_s6 = int_to_ptr.vmem [resolvable:$false] %s1077_s6 }
  0x13   : > { %v303_v23 = vand.u32 (!%p191_p9), 15, %v1244_v21  ;;  %vm1248_vm3 = vcmp.lt.s32.totalorder (!%p191_p9), %v296_v22, 15  ;;  %vm1258_vm7 = vcmp.ge.s32.totalorder (!%p191_p9), %v296_v22, 1  ;;  %vm313_vm9 = vcmp.lt.s32.totalorder (!%p191_p9), %v1244_v21, 240  ;;  %v896_v21 = vld [vmem:[%s1537_s3 + $0xc] sm:$0xf] (!%p191_p9) }
  0x15   : > { %s219_s7 = scalar_select %p218_p10, %s1194_s22, 1  ;;  %vm1253_vm5 = vcmp.lt.s32.totalorder %v303_v23, 15  ;;  %vm1262_vm8 = vcmp.ge.s32.totalorder %v303_v23, 1 }
  0x17   : > { %s904_s8 = sshll.u32 %s219_s7, 3  ;;  %s1079_s7 = scalar_lea.vmem %s1078_s6, 512 }
  0x18   : > { %s222_s11 = scalar_lea.vmem %s1534_s0, %s904_s8 }
  0x19   : > { %v224_v2 = vld [vmem:[%s222_s11] sm:$0xff] }
  0x1a   : > { %v227_v3 = vcombine.high %v224_v2, %v224_v2  ;;  %v229_v4 = vpack.c.bf16 %v224_v2, %v224_v2 }
  0x1c   : > { %v230_v5 = vpack.c.bf16 %v227_v3, %v227_v3  ;;  %v243_v6 = vsel %vm241_vm0, %v229_v4, 0 }
  0x1e   : > { %886 = vmatprep.subr.msk.bf16.mxu0 %vm241_vm0, %v230_v5 }
  0x1f   : > { %249 = vmatpush1.bf16.msra.mxu0 %v243_v6 }
  0x22   : > { %887 = vmatmul.mubr.msk.bf16.vlgmr.msra.gmra.mrb[0].mxu0 %vm237_vm1, %v225_v7 }
  0x23   : > { %514 = vmatprep.mubr.bf16.mxu0 %v1137_v0 }
  0x8e   : > { %v235_v8 = vpop.permute.xlu0 %234 }
  0xf5   : > { %v282_v9 = vpop.f32.mrb[0].mxu0 }
  0xf6   : > { %v283_v10 = vadd.f32 %v282_v9, %v235_v8  ;;  %v284_v11 = vpop.f32.mrb[1].mxu0 }
  0xf7   : > { %v285_v12 = vadd.f32 %v284_v11, %v235_v8  ;;  %v286_v13 = vpop.f32.mrb[2].mxu0 }
  0xf8   : > { %v287_v14 = vpop.f32.mrb[3].mxu0  ;;  %v315_v15 = vpack.c.bf16 %v283_v10, %v283_v10 }
  0xf9   : > { %v316_v16 = vpack.c.bf16 %v285_v12, %v285_v12  ;;  %v956_v17 = vpack.i.bf16 %v285_v12, %v283_v10 }
  0xfa   : > { %v477_v18 = vsel %vm425_vm2, %v315_v15, 0 }
  0xfb   : > { %891 = vmatprep.subr.msk.bf16.mxu0 %vm425_vm2, %v316_v16  ;;  %957 = vrot.lane.b32.xlu1 %v956_v17, %s1138_s14 }
  0xfc   : > { %952 = vrot.lane.b32.xlu0 %v956_v17, %s1139_s15  ;;  %483 = vmatpush1.bf16.msra.mxu0 %v477_v18 }
  0xff   : > { %892 = vmatmul.mubr.msk.bf16.vlgmr.msra.gmra.mrb[4].mxu0 %vm421_vm13, %v314_v30 }
 0x100   : > { %784 = vmatprep.mubr.bf16.mxu0 %v1137_v0 }
 0x16d   : > { %v958_v25 = vpop.permute.xlu1 %957 }
 0x16e   : > { %v960_v27 = vunpack.i.h.bf16 %v958_v25  ;;  %v959_v28 = vunpack.i.l.bf16 %v958_v25  ;;  %v953_v29 = vpop.permute.xlu0 %952 }
 0x16f   : > { %v955_v32 = vunpack.i.h.bf16 %v953_v29  ;;  %v954_v33 = vunpack.i.l.bf16 %v953_v29 }
 0x170   : > { %v335_v34 = vsel %vm334_vm4, %v959_v28, %v960_v27  ;;  %v336_v35 = vsel %vm334_vm4, %v960_v27, %v959_v28 }
 0x171   : > { %v341_v36 = vsel %vm1248_vm3, %v335_v34, -inf  ;;  %v342_v37 = vsel %vm1253_vm5, %v336_v35, -inf  ;;  %v322_v38 = vsel %vm321_vm6, %v954_v33, %v955_v32  ;;  %v323_v39 = vsel %vm321_vm6, %v955_v32, %v954_v33 }
 0x172   : > { %v328_v40 = vsel %vm1258_vm7, %v323_v39, -inf  ;;  %v329_v41 = vsel %vm1262_vm8, %v322_v38, -inf }
 0x173   : > { %v343_v42 = vmax.f32 %v328_v40, %v341_v36  ;;  %v344_v43 = vmax.f32 %v329_v41, %v342_v37 }
 0x175   : > { %v345_v44 = vmax.f32 %v283_v10, %v343_v42  ;;  %v346_v45 = vmax.f32 %v285_v12, %v344_v43 }
 0x177   : > { %v966_v46 = vpack.i.bf16 %v346_v45, %v345_v44 }
 0x179   : > { %967 = vrot.lane.b32.xlu0 %v966_v46, %s1138_s14  ;;  %962 = vrot.lane.b32.xlu1 %v966_v46, %s1139_s15 }
 0x1d2   : > { %v516_v20 = vpop.f32.mrb[4].mxu0 }
 0x1eb   : > { %v968_v47 = vpop.permute.xlu0 %967  ;;  %v963_v48 = vpop.permute.xlu1 %962 }
 0x1ec   : > { %v970_v49 = vunpack.i.h.bf16 %v968_v47  ;;  %v969_v50 = vunpack.i.l.bf16 %v968_v47  ;;  %v965_v51 = vunpack.i.h.bf16 %v963_v48  ;;  %v964_v52 = vunpack.i.l.bf16 %v963_v48 }
 0x1ee   : > { %v359_v53 = vsel %vm334_vm4, %v969_v50, %v970_v49  ;;  %v360_v54 = vsel %vm334_vm4, %v970_v49, %v969_v50  ;;  %v351_v55 = vsel %vm321_vm6, %v964_v52, %v965_v51  ;;  %v352_v56 = vsel %vm321_vm6, %v965_v51, %v964_v52 }
 0x1ef   : > { %v361_v57 = vsel %vm1248_vm3, %v359_v53, -inf  ;;  %v362_v58 = vsel %vm1253_vm5, %v360_v54, -inf  ;;  %v353_v59 = vsel %vm1258_vm7, %v352_v56, -inf  ;;  %v354_v60 = vsel %vm1262_vm8, %v351_v55, -inf }
 0x1f0   : > { %v363_v61 = vmax.f32 %v353_v59, %v361_v57  ;;  %v364_v62 = vmax.f32 %v354_v60, %v362_v58 }
 0x1f2   : > { %v365_v63 = vmax.f32 %v345_v44, %v363_v61  ;;  %v366_v1 = vmax.f32 %v346_v45, %v364_v62 }
 0x1f4   : > { %v976_v2 = vpack.i.bf16 %v366_v1, %v365_v63 }
 0x1f6   : > { %977 = vrot.lane.b32.xlu0 %v976_v2, %s1140_s16  ;;  %972 = vrot.lane.b32.xlu1 %v976_v2, %s1141_s17 }
 0x268   : > { %v978_v3 = vpop.permute.xlu0 %977  ;;  %v973_v4 = vpop.permute.xlu1 %972 }
 0x269   : > { %v980_v5 = vunpack.i.h.bf16 %v978_v3  ;;  %v979_v6 = vunpack.i.l.bf16 %v978_v3  ;;  %v975_v7 = vunpack.i.h.bf16 %v973_v4  ;;  %v974_v8 = vunpack.i.l.bf16 %v973_v4 }
 0x26b   : > { %v385_v9 = vsel %vm384_vm10, %v979_v6, %v980_v5  ;;  %v386_v10 = vsel %vm384_vm10, %v980_v5, %v979_v6  ;;  %v372_v11 = vsel %vm371_vm12, %v974_v8, %v975_v7  ;;  %v373_v12 = vsel %vm371_vm12, %v975_v7, %v974_v8 }
 0x26c   : > { %v392_v13 = vsel %vm313_vm9, %v386_v10, -inf  ;;  %v378_v14 = vsel %vm310_vm11, %v373_v12, -inf }
 0x26d   : > { %v393_v15 = vmax.f32 %v378_v14, %v385_v9  ;;  %v394_v16 = vmax.f32 %v372_v11, %v392_v13 }
 0x26f   : > { %v395_v17 = vmax.f32 %v365_v63, %v393_v15  ;;  %v396_v18 = vmax.f32 %v366_v1, %v394_v16 }
 0x271   : > { %v986_v19 = vpack.i.bf16 %v396_v18, %v395_v17 }
 0x273   : > { %987 = vrot.lane.b32.xlu0 %v986_v19, %s1140_s16  ;;  %982 = vrot.lane.b32.xlu1 %v986_v19, %s1141_s17 }
 0x2e5   : > { %v988_v22 = vpop.permute.xlu0 %987  ;;  %v983_v23 = vpop.permute.xlu1 %982 }
 0x2e6   : > { %v990_v25 = vunpack.i.h.bf16 %v988_v22  ;;  %v989_v27 = vunpack.i.l.bf16 %v988_v22  ;;  %v985_v28 = vunpack.i.h.bf16 %v983_v23  ;;  %v984_v29 = vunpack.i.l.bf16 %v983_v23 }
 0x2e8   : > { %v409_v32 = vsel %vm384_vm10, %v989_v27, %v990_v25  ;;  %v410_v33 = vsel %vm384_vm10, %v990_v25, %v989_v27  ;;  %v401_v34 = vsel %vm371_vm12, %v984_v29, %v985_v28  ;;  %v402_v35 = vsel %vm371_vm12, %v985_v28, %v984_v29 }
 0x2e9   : > { %v412_v36 = vsel %vm313_vm9, %v410_v33, -inf  ;;  %v403_v37 = vsel %vm310_vm11, %v402_v35, -inf }
 0x2ea   : > { %v413_v38 = vmax.f32 %v403_v37, %v409_v32  ;;  %v414_v39 = vmax.f32 %v401_v34, %v412_v36 }
 0x2ec   : > { %v415_v40 = vmax.f32 %v395_v17, %v413_v38  ;;  %v416_v41 = vmax.f32 %v396_v18, %v414_v39 }
 0x2ee   : > { %v996_v42 = vpack.i.bf16 %v416_v41, %v415_v40  ;;  %v420_v43 = vpack.c.bf16 %v416_v41, %v416_v41  ;;  %v419_v44 = vpack.c.bf16 %v415_v40, %v415_v40 }
 0x2f0   : > { %997 = vrot.lane.b32.xlu0 %v996_v42, %s1138_s14  ;;  %992 = vrot.lane.b32.xlu1 %v996_v42, %s1139_s15  ;;  %v427_v45 = vsel %vm425_vm2, %v419_v44, 0  ;;  %v888_v44 = vld [vmem:[%s1537_s3 + $0x4] sm:$0xf] }
 0x2f1   : > { %889 = vmatprep.subr.msk.bf16.mxu1 %vm425_vm2, %v420_v43 }
 0x2f2   : > { %433 = vmatpush1.bf16.msra.mxu1 %v427_v45 }
 0x2f5   : > { %890 = vmatmul.mubr.msk.bf16.vlgmr.msra.gmra.mrb[0].mxu1 %vm421_vm13, %v888_v44 }
 0x2f6   : > { %648 = vmatprep.mubr.bf16.mxu1 %v1137_v0 }
 0x362   : > { %v998_v46 = vpop.permute.xlu0 %997  ;;  %v993_v47 = vpop.permute.xlu1 %992 }
 0x363   : > { %v1000_v48 = vunpack.i.h.bf16 %v998_v46  ;;  %v999_v49 = vunpack.i.l.bf16 %v998_v46  ;;  %v995_v50 = vunpack.i.h.bf16 %v993_v47  ;;  %v994_v51 = vunpack.i.l.bf16 %v993_v47 }
 0x365   : > { %v535_v52 = vsel %vm334_vm4, %v999_v49, %v1000_v48  ;;  %v536_v53 = vsel %vm334_vm4, %v1000_v48, %v999_v49  ;;  %v527_v54 = vsel %vm321_vm6, %v994_v51, %v995_v50  ;;  %v528_v55 = vsel %vm321_vm6, %v995_v50, %v994_v51 }
 0x366   : > { %v537_v56 = vsel %vm1248_vm3, %v535_v52, -inf  ;;  %v538_v57 = vsel %vm1253_vm5, %v536_v53, -inf  ;;  %v529_v58 = vsel %vm1258_vm7, %v528_v55, -inf  ;;  %v530_v59 = vsel %vm1262_vm8, %v527_v54, -inf }
 0x367   : > { %v539_v60 = vmax.f32 %v529_v58, %v537_v56  ;;  %v540_v61 = vmax.f32 %v530_v59, %v538_v57 }
 0x369   : > { %v541_v62 = vmax.f32 %v415_v40, %v539_v60  ;;  %v542_v63 = vmax.f32 %v416_v41, %v540_v61 }
 0x36b   : > { %v1006_v1 = vpack.i.bf16 %v542_v63, %v541_v62 }
 0x36d   : > { %1007 = vrot.lane.b32.xlu0 %v1006_v1, %s1138_s14  ;;  %1002 = vrot.lane.b32.xlu1 %v1006_v1, %s1139_s15 }
 0x3df   : > { %v1008_v2 = vpop.permute.xlu0 %1007  ;;  %v1003_v3 = vpop.permute.xlu1 %1002 }
 0x3e0   : > { %v1010_v4 = vunpack.i.h.bf16 %v1008_v2  ;;  %v1009_v5 = vunpack.i.l.bf16 %v1008_v2  ;;  %v1005_v6 = vunpack.i.h.bf16 %v1003_v3  ;;  %v1004_v7 = vunpack.i.l.bf16 %v1003_v3 }
 0x3e2   : > { %v555_v8 = vsel %vm334_vm4, %v1009_v5, %v1010_v4  ;;  %v556_v9 = vsel %vm334_vm4, %v1010_v4, %v1009_v5  ;;  %v547_v10 = vsel %vm321_vm6, %v1004_v7, %v1005_v6  ;;  %v548_v11 = vsel %vm321_vm6, %v1005_v6, %v1004_v7 }
 0x3e3   : > { %v557_v12 = vsel %vm1248_vm3, %v555_v8, -inf  ;;  %v558_v13 = vsel %vm1253_vm5, %v556_v9, -inf  ;;  %v549_v14 = vsel %vm1258_vm7, %v548_v11, -inf  ;;  %v550_v15 = vsel %vm1262_vm8, %v547_v10, -inf }
 0x3e4   : > { %v559_v16 = vmax.f32 %v549_v14, %v557_v12  ;;  %v560_v17 = vmax.f32 %v550_v15, %v558_v13 }
 0x3e6   : > { %v561_v18 = vmax.f32 %v541_v62, %v559_v16  ;;  %v562_v19 = vmax.f32 %v542_v63, %v560_v17 }
 0x3e8   : > { %v1016_v22 = vpack.i.bf16 %v562_v19, %v561_v18 }
 0x3ea   : > { %1017 = vrot.lane.b32.xlu0 %v1016_v22, %s1140_s16  ;;  %1012 = vrot.lane.b32.xlu1 %v1016_v22, %s1141_s17 }
 0x45c   : > { %v1018_v23 = vpop.permute.xlu0 %1017  ;;  %v1013_v25 = vpop.permute.xlu1 %1012 }
 0x45d   : > { %v1020_v27 = vunpack.i.h.bf16 %v1018_v23  ;;  %v1019_v28 = vunpack.i.l.bf16 %v1018_v23  ;;  %v1015_v29 = vunpack.i.h.bf16 %v1013_v25  ;;  %v1014_v32 = vunpack.i.l.bf16 %v1013_v25 }
 0x45f   : > { %v575_v33 = vsel %vm384_vm10, %v1019_v28, %v1020_v27  ;;  %v576_v34 = vsel %vm384_vm10, %v1020_v27, %v1019_v28  ;;  %v567_v35 = vsel %vm371_vm12, %v1014_v32, %v1015_v29  ;;  %v568_v36 = vsel %vm371_vm12, %v1015_v29, %v1014_v32 }
 0x460   : > { %v578_v37 = vsel %vm313_vm9, %v576_v34, -inf  ;;  %v569_v38 = vsel %vm310_vm11, %v568_v36, -inf }
 0x461   : > { %v579_v39 = vmax.f32 %v569_v38, %v575_v33  ;;  %v580_v40 = vmax.f32 %v567_v35, %v578_v37 }
 0x463   : > { %v581_v41 = vmax.f32 %v561_v18, %v579_v39  ;;  %v582_v42 = vmax.f32 %v562_v19, %v580_v40 }
 0x465   : > { %v1026_v43 = vpack.i.bf16 %v582_v42, %v581_v41 }
 0x467   : > { %1027 = vrot.lane.b32.xlu0 %v1026_v43, %s1140_s16  ;;  %1022 = vrot.lane.b32.xlu1 %v1026_v43, %s1141_s17 }
 0x4d9   : > { %v1028_v45 = vpop.permute.xlu0 %1027  ;;  %v1023_v46 = vpop.permute.xlu1 %1022 }
 0x4da   : > { %v1030_v47 = vunpack.i.h.bf16 %v1028_v45  ;;  %v1029_v48 = vunpack.i.l.bf16 %v1028_v45  ;;  %v1025_v49 = vunpack.i.h.bf16 %v1023_v46  ;;  %v1024_v50 = vunpack.i.l.bf16 %v1023_v46 }
 0x4dc   : > { %v595_v51 = vsel %vm384_vm10, %v1029_v48, %v1030_v47  ;;  %v596_v52 = vsel %vm384_vm10, %v1030_v47, %v1029_v48  ;;  %v587_v53 = vsel %vm371_vm12, %v1024_v50, %v1025_v49  ;;  %v588_v54 = vsel %vm371_vm12, %v1025_v49, %v1024_v50 }
 0x4dd   : > { %v598_v55 = vsel %vm313_vm9, %v596_v52, -inf  ;;  %v589_v56 = vsel %vm310_vm11, %v588_v54, -inf }
 0x4de   : > { %v599_v57 = vmax.f32 %v589_v56, %v595_v51  ;;  %v600_v58 = vmax.f32 %v587_v53, %v598_v55 }
 0x4e0   : > { %v601_v59 = vmax.f32 %v581_v41, %v599_v57  ;;  %v602_v60 = vmax.f32 %v582_v42, %v600_v58 }
 0x4e2   : > { %v1036_v61 = vpack.i.bf16 %v602_v60, %v601_v59  ;;  %v606_v62 = vpack.c.bf16 %v602_v60, %v602_v60  ;;  %v605_v63 = vpack.c.bf16 %v601_v59, %v601_v59 }
 0x4e4   : > { %1037 = vrot.lane.b32.xlu0 %v1036_v61, %s1138_s14  ;;  %1032 = vrot.lane.b32.xlu1 %v1036_v61, %s1139_s15  ;;  %v611_v1 = vsel %vm425_vm2, %v605_v63, 0  ;;  %v795_v61 = vld [vmem:[%s1538_s4] sm:$0xff] }
 0x4e5   : > { %894 = vmatprep.subr.msk.bf16.mxu1 %vm425_vm2, %v606_v62  ;;  %v466_v62 = vpop.f32.mrb[0].mxu1 }
 0x4e6   : > { %617 = vmatpush1.bf16.msra.mxu1 %v611_v1  ;;  %v468_v63 = vpop.f32.mrb[1].mxu1 }
 0x4e7   : > { %v470_v1 = vpop.f32.mrb[2].mxu1 }
 0x4e9   : > { %895 = vmatmul.mubr.msk.bf16.vlgmr.msra.gmra.mrb[4].mxu1 %vm421_vm13, %v893_v31 }
 0x556   : > { %v1038_v2 = vpop.permute.xlu0 %1037  ;;  %v1033_v3 = vpop.permute.xlu1 %1032 }
 0x557   : > { %v1040_v4 = vunpack.i.h.bf16 %v1038_v2  ;;  %v1039_v5 = vunpack.i.l.bf16 %v1038_v2  ;;  %v1035_v6 = vunpack.i.h.bf16 %v1033_v3  ;;  %v1034_v7 = vunpack.i.l.bf16 %v1033_v3  ;;  %v471_v2 = vpop.f32.mrb[3].mxu1 }
 0x559   : > { %v671_v8 = vsel %vm334_vm4, %v1039_v5, %v1040_v4  ;;  %v672_v9 = vsel %vm334_vm4, %v1040_v4, %v1039_v5  ;;  %v663_v10 = vsel %vm321_vm6, %v1034_v7, %v1035_v6  ;;  %v664_v11 = vsel %vm321_vm6, %v1035_v6, %v1034_v7 }
 0x55a   : > { %v673_v12 = vsel %vm1248_vm3, %v671_v8, -inf  ;;  %v674_v13 = vsel %vm1253_vm5, %v672_v9, -inf  ;;  %v665_v14 = vsel %vm1258_vm7, %v664_v11, -inf  ;;  %v666_v15 = vsel %vm1262_vm8, %v663_v10, -inf }
 0x55b   : > { %v675_v16 = vmax.f32 %v665_v14, %v673_v12  ;;  %v676_v17 = vmax.f32 %v666_v15, %v674_v13 }
 0x55d   : > { %v677_v18 = vmax.f32 %v601_v59, %v675_v16  ;;  %v678_v19 = vmax.f32 %v602_v60, %v676_v17 }
 0x55f   : > { %v1046_v22 = vpack.i.bf16 %v678_v19, %v677_v18 }
 0x561   : > { %1047 = vrot.lane.b32.xlu0 %v1046_v22, %s1138_s14  ;;  %1042 = vrot.lane.b32.xlu1 %v1046_v22, %s1139_s15  ;;  %s905_s14 = sshll.u32 %s1194_s22, 8  ;;  %s217_s15 = scalar_lea.vmem [#allocation2], %s883_s13 }
 0x562   : > { %s1492_s25 = scalar_lea.hbm %s1539_s5, %s905_s14  ;;  %s806_s22 = scalar_lea.sflag [#allocation3], %s215_s12 }
 0x5d3   : > { %v1048_v23 = vpop.permute.xlu0 %1047  ;;  %v1043_v25 = vpop.permute.xlu1 %1042 }
 0x5d4   : > { %v1050_v27 = vunpack.i.h.bf16 %v1048_v23  ;;  %v1049_v28 = vunpack.i.l.bf16 %v1048_v23  ;;  %v1045_v29 = vunpack.i.h.bf16 %v1043_v25  ;;  %v1044_v32 = vunpack.i.l.bf16 %v1043_v25  ;;  %v518_v25 = vpop.f32.mrb[5].mxu0 }
 0x5d5   : > { %v517_v23 = vadd.f32 %v516_v20, %v466_v62 }
 0x5d6   : > { %v691_v33 = vsel %vm334_vm4, %v1049_v28, %v1050_v27  ;;  %v692_v34 = vsel %vm334_vm4, %v1050_v27, %v1049_v28  ;;  %v683_v35 = vsel %vm321_vm6, %v1044_v32, %v1045_v29  ;;  %v684_v36 = vsel %vm321_vm6, %v1045_v29, %v1044_v32  ;;  %v650_v27 = vpop.f32.mrb[4].mxu1  ;;  %v520_v29 = vpop.f32.mrb[6].mxu0 }
 0x5d7   : > { %v693_v37 = vsel %vm1248_vm3, %v691_v33, -inf  ;;  %v694_v38 = vsel %vm1253_vm5, %v692_v34, -inf  ;;  %v685_v39 = vsel %vm1258_vm7, %v684_v36, -inf  ;;  %v686_v40 = vsel %vm1262_vm8, %v683_v35, -inf  ;;  %v652_v32 = vpop.f32.mrb[5].mxu1  ;;  %v521_v34 = vpop.f32.mrb[7].mxu0 }
 0x5d8   : > { %v695_v41 = vmax.f32 %v685_v39, %v693_v37  ;;  %v696_v42 = vmax.f32 %v686_v40, %v694_v38  ;;  %v519_v28 = vadd.f32 %v518_v25, %v468_v63  ;;  %v657_v33 = vadd.f32 %v650_v27, %v517_v23  ;;  %v654_v35 = vpop.f32.mrb[6].mxu1 }
 0x5d9   : > { %v655_v37 = vpop.f32.mrb[7].mxu1 }
 0x5da   : > { %v697_v43 = vmax.f32 %v677_v18, %v695_v41  ;;  %v698_v44 = vmax.f32 %v678_v19, %v696_v42  ;;  %v658_v36 = vadd.f32 %v652_v32, %v519_v28 }
 0x5dc   : > { %v1056_v45 = vpack.i.bf16 %v698_v44, %v697_v43 }
 0x5de   : > { %1057 = vrot.lane.b32.xlu0 %v1056_v45, %s1140_s16  ;;  %1052 = vrot.lane.b32.xlu1 %v1056_v45, %s1141_s17 }
 0x650   : > { %v1058_v24 = vpop.permute.xlu0 %1057  ;;  %v1053_v46 = vpop.permute.xlu1 %1052 }
 0x651   : > { %v1060_v47 = vunpack.i.h.bf16 %v1058_v24  ;;  %v1059_v26 = vunpack.i.l.bf16 %v1058_v24  ;;  %v1055_v48 = vunpack.i.h.bf16 %v1053_v46  ;;  %v1054_v49 = vunpack.i.l.bf16 %v1053_v46 }
 0x653   : > { %v711_v50 = vsel %vm384_vm10, %v1059_v26, %v1060_v47  ;;  %v712_v51 = vsel %vm384_vm10, %v1060_v47, %v1059_v26  ;;  %v703_v52 = vsel %vm371_vm12, %v1054_v49, %v1055_v48  ;;  %v704_v53 = vsel %vm371_vm12, %v1055_v48, %v1054_v49 }
 0x654   : > { %v714_v54 = vsel %vm313_vm9, %v712_v51, -inf  ;;  %v705_v55 = vsel %vm310_vm11, %v704_v53, -inf }
 0x655   : > { %v715_v56 = vmax.f32 %v705_v55, %v711_v50  ;;  %v716_v57 = vmax.f32 %v703_v52, %v714_v54 }
 0x657   : > { %v717_v58 = vmax.f32 %v697_v43, %v715_v56  ;;  %v718_v59 = vmax.f32 %v698_v44, %v716_v57 }
 0x659   : > { %v1066_v60 = vpack.i.bf16 %v718_v59, %v717_v58 }
 0x65b   : > { %1067 = vrot.lane.b32.xlu0 %v1066_v60, %s1140_s16  ;;  %1062 = vrot.lane.b32.xlu1 %v1066_v60, %s1141_s17  ;;  %s820_s16 = sshll.u32 %s217_s15, 4  ;;  %s1494_s16 = int_to_ptr.vmem [resolvable:$true] %s820_s16 }
 0x65c   : > { %s1073_s26 = scalar_lea.vmem %s1494_s16, 256  ;;  %p1080_p0 = scmp.lt.s32.totalorder %s1494_s16, %s1078_s6 }
 0x65d   : > { %p1074_p11 = scmp.ne.s32.totalorder %s1494_s16, %s1073_s26  ;;  %p1081_p1 = scmp.lt.s32.totalorder %s1079_s7, %s1073_s26 }
 0x65f   : > { %798 = vperm.xlu1 %1071, %v795_v61   ;;  %p1075_p12 = pnand %p1074_p11, %p1211_p5  ;;  %p1082_p2 = por %p1081_p1, %p1080_p0 }
 0x661   : > { %p1076_p13 = pneg %p1075_p12 }
 0x663   : > { %p1083_p3 = pnand %p1082_p2, %p1076_p13 }
 0x6cd   : > { %v1068_v3 = vpop.permute.xlu0 %1067  ;;  %v1063_v0 = vpop.permute.xlu1 %1062 }
 0x6ce   : > { %v1070_v4 = vunpack.i.h.bf16 %v1068_v3  ;;  %v1069_v5 = vunpack.i.l.bf16 %v1068_v3  ;;  %v1065_v6 = vunpack.i.h.bf16 %v1063_v0  ;;  %v1064_v7 = vunpack.i.l.bf16 %v1063_v0 }
 0x6d0   : > { %v731_v8 = vsel %vm384_vm10, %v1069_v5, %v1070_v4  ;;  %v732_v9 = vsel %vm384_vm10, %v1070_v4, %v1069_v5  ;;  %v723_v10 = vsel %vm371_vm12, %v1064_v7, %v1065_v6  ;;  %v724_v11 = vsel %vm371_vm12, %v1065_v6, %v1064_v7 }
 0x6d1   : > { %v734_v12 = vsel %vm313_vm9, %v732_v9, -inf  ;;  %v725_v13 = vsel %vm310_vm11, %v724_v11, -inf }
 0x6d2   : > { %v736_v14 = vmax.f32 %v723_v10, %v734_v12  ;;  %v735_v15 = vmax.f32 %v725_v13, %v731_v8 }
 0x6d4   : > { %v738_v16 = vmax.f32 %v718_v59, %v736_v14  ;;  %v737_v17 = vmax.f32 %v717_v58, %v735_v15 }
 0x6d6   : > { %v742_v18 = vpack.c.bf16 %v738_v16, %v738_v16  ;;  %v741_v19 = vpack.c.bf16 %v737_v17, %v737_v17 }
 0x6d8   : > { %897 = vmatprep.subr.msk.bf16.mxu0 %vm425_vm2, %v742_v18  ;;  %v747_v22 = vsel %vm425_vm2, %v741_v19, 0 }
 0x6d9   : > { %753 = vmatpush1.bf16.msra.mxu0 %v747_v22 }
 0x6dc   : > { %898 = vmatmul.mubr.msk.bf16.vlgmr.msra.gmra.mrb[8].mxu0 %vm421_vm13, %v896_v21 }
 0x6de   : > { %v799_v39 = vpop.permute.xlu1 %798 }
 0x7af   : > { %v786_v38 = vpop.f32.mrb[8].mxu0 }
 0x7b0   : > { %v793_v40 = vadd.f32 %v786_v38, %v657_v33  ;;  %v788_v41 = vpop.f32.mrb[9].mxu0 }
 0x7b1   : > { %v794_v42 = vadd.f32 %v788_v41, %v658_v36  ;;  %v790_v43 = vpop.f32.mrb[10].mxu0 }
 0x7b2   : > { %v801_v44 = vadd.f32 %v799_v39, %v793_v40  ;;  %v791_v45 = vpop.f32.mrb[11].mxu0 }
 0x7b3   : > { %v802_v24 = vadd.f32 %v799_v39, %v794_v42 }
 0x7b4   : > { %803 = vst [vmem:[%s217_s15] sm:$0xff] %v801_v44 }
 0x7b5   : > { %804 = vst [vmem:[%s217_s15 + $0x8] sm:$0xff] %v802_v24 }
 0x7b6   : > { %1086 = shalt.err (!%p1083_p3)
}
 0x7b7   : > { %s1087_s8 = scalar_lea.hbm %s1492_s25, 256  ;;  %s1091_s11 = scalar_lea.hbm %s1539_s5, 512 }
 0x7b8   : > { %p1088_p4 = scmp.ne.s32.totalorder %s1492_s25, %s1087_s8  ;;  %p1092_p9 = scmp.lt.u32.totalorder %s1492_s25, %s1539_s5 }
 0x7b9   : > { %p1093_p10 = scmp.lt.u32.totalorder %s1091_s11, %s1087_s8  ;;  %p1095_p12 = scmp.lt.u32.totalorder %s1087_s8, %s1492_s25 }
 0x7ba   : > { %p1089_p7 = pnand %p1088_p4, %p1211_p5 }
 0x7bb   : > { %p1094_p11 = por %p1093_p10, %p1092_p9 }
 0x7bc   : > { %p1090_p8 = pneg %p1089_p7 }
 0x7bd   : > { %p1096_p13 = por %p1095_p12, %p1094_p11 }
 0x7bf   : > { %p1097_p0 = pnand %p1096_p13, %p1090_p8 }
 0x7c1   : > { %1100 = shalt.err (!%p1097_p0)
}
 0x7c2   : > { %906 = dma.vmem_to_hbm [thread:$0]  (%p1211_p5), %s1494_s16, 256, %s1492_s25, %s806_s22  }
 0x7c3 PF: > { %p912_p1 = scmp.ge.s32.totalorder %s1135_s21, 2  ;;  %s832_s14 = sand.u32 1, %s1123_s18  }
 0x7c4   : > { %s833_s15 = scalar_lea.sflag [#allocation3], %s832_s14 }
 0x7c5   : > { %p909_p2 = pnand %p912_p1, %p1215_p6 }
 0x7c7   : > { %1118 = dma.done.wait (!%p909_p2), %s833_s15, 256  }
 0x7c8   : > { %1120 = vsyncadd (!%p909_p2), %s833_s15, 4294967040  ;;  %p15_p3 = scmp.ge.s32.totalorder %s1198_s24, 4   ;;  %s1550_s18 = smov %s1127_s19 }
 0x7c9   : > { %s1551_s19 = smov %s1131_s20  ;;  %s1552_s20 = smov %s1209_s27 }
 0x7ca   : > { %s1553_s21 = smov %s1198_s24  ;;  %17 = sbr.rel (!%p15_p3) target bundleno = 3 (0x3), region = 78 }
 0x7d1   :  { %838 = vsyncpa [#allocation3], 1 }
 0x7d2   :  { %840 = vsyncpa [#allocation3 + $0x1], 1 }

</bundles_post_ra>
